<compile_context>
chip_gen: v7x
topology: tpu7x:2x2x1
jax: 0.10.0
libtpu: 0.0.40
codegen_flags: <defaults>
</compile_context>

<pallas_src>
import functools

import jax
import jax.numpy as jnp
from jax import lax
from jax.experimental import pallas as pl
from jax.experimental.pallas import tpu as pltpu

EPS = 1e-12


def _round_up(n, m):
    return ((n + m - 1) // m) * m


def _chip_info():
    """Returns (num_tensorcores, vmem_budget_bytes) for the local TPU."""
    kind = ""
    try:
        d = jax.devices()[0]
        if d.platform == "tpu":
            kind = d.device_kind.lower()
    except Exception:
        pass
    if "v7" in kind or "7x" in kind:
        # v7x: 64 MiB VMEM per TensorCore, 2 TensorCores per chip.
        return 2, 48 * 1024 * 1024
    # v5e / v6e: 128 MiB VMEM, 1 TensorCore.
    return 1, 100 * 1024 * 1024


def _vmem_footprint(tm, H, x_itemsize, w_itemsize):
    io = 2 * 2 * tm * H * x_itemsize       # double-buffered x-in + out tiles
    w_bytes = H * H * w_itemsize           # W resident once (constant index)
    interm = 4 * tm * H * 4                # f32 LN / matmul intermediates
    return io + w_bytes + interm + H * 4 + (1 << 20)  # + bias + slack


def _sublayer_connection_kernel(x_ref, w_ref, b_ref, o_ref, *, mxu_dtype,
                                precision):
    # x_ref: (tm, H) tile of input rows (auto-pipelined / double-buffered)
    # w_ref: (H, H)  folded weight diag(gamma) @ W, already in mxu_dtype
    # b_ref: (1, H)  folded bias beta @ W + b, f32
    # o_ref: (tm, H) output tile
    #
    # Note: in the ragged last grid step, rows beyond M hold stale VMEM; they
    # are computed on but never written back (Pallas clips the output store).
    x = x_ref[...].astype(jnp.float32)

    # LayerNorm statistics (biased variance, eps inside the sqrt). The affine
    # (gamma, beta) is folded into w/b in the wrapper.
    u = jnp.mean(x, axis=-1, keepdims=True)
    xc = x - u
    s = jnp.mean(xc * xc, axis=-1, keepdims=True)
    xn = xc * lax.rsqrt(s + EPS)                           # rsqrt -> EUP slot

    # Sublayer: Linear(H -> H) on the MXU with f32 accumulation.
    y = jnp.dot(xn.astype(mxu_dtype), w_ref[...],
                preferred_element_type=jnp.float32, precision=precision)
    y = y + b_ref[...]

    # Dropout: eval-mode identity.
    # TODO(synk): training-mode dropout (pltpu.prng_random_bits mask) not applied.
    o_ref[...] = (x + y).astype(o_ref.dtype)


def sublayer_connection(x, gamma, beta, w, b, *, tm=None):
    """x: [B, S, H]; w: [H_in, H_out]. Returns x + Linear(LayerNorm(x))."""
    B, S, H = x.shape
    M = B * S
    assert w.shape == (H, H), (
        "w must be laid out [in, out]; transpose PyTorch nn.Linear.weight.")
    assert gamma.shape == (H,) and beta.shape == (H,) and b.shape == (H,)
    # Production note: keep H a multiple of 128 (lane-dense stores); H=32 here
    # is only the small correctness shape.

    mxu_dtype = jnp.bfloat16 if x.dtype == jnp.bfloat16 else jnp.float32
    # f32 inputs: exact-f32 MXU passes (PyTorch parity); bf16: native bf16 MXU.
    precision = (lax.Precision.HIGHEST if mxu_dtype == jnp.float32
                 else lax.Precision.DEFAULT)

    # Fold the LayerNorm affine into the Linear (exact algebra), once, in f32:
    #   (g*xh + be) @ W + b == xh @ (diag(g) @ W) + (be @ W + b)
    g32 = gamma.astype(jnp.float32)
    be32 = beta.astype(jnp.float32)
    w32 = w.astype(jnp.float32)
    w_fold = (g32[:, None] * w32).astype(mxu_dtype)   # pre-cast once, not per step
    b_fold = (be32 @ w32 + b.astype(jnp.float32)).reshape(1, H)

    n_cores, vmem_budget = _chip_info()
    x_itemsize = jnp.dtype(x.dtype).itemsize
    w_itemsize = jnp.dtype(mxu_dtype).itemsize

    # Row tiling: 8-aligned, as large as fits the per-chip VMEM budget.
    M8 = _round_up(M, 8)
    tm_eff = min(_round_up(tm, 8) if tm else 1024, M8)
    tm_eff = _round_up(tm_eff, 8)
    while tm_eff > 8 and _vmem_footprint(tm_eff, H, x_itemsize,
                                         w_itemsize) > vmem_budget:
        tm_eff = _round_up(tm_eff // 2, 8)
    if _vmem_footprint(tm_eff, H, x_itemsize, w_itemsize) > vmem_budget:
        # TODO(synk): add a W-column-tiled second grid axis ("arbitrary",
        # reduction-last) with the LN result cached in a (tm, H) scratch when
        # H^2 alone no longer fits VMEM (H >~ 2048 f32 on v7x's 64 MiB).
        raise NotImplementedError(
            f"hidden_size={H} requires a W-column-tiled kernel on this chip")

    if n_cores > 1 and M8 >= 16:
        # Two TensorCores (v7x): even step count so the megacore shard of the
        # "parallel" row axis is balanced.
        n_steps = max(2, _round_up(pl.cdiv(M8, tm_eff), 2))
        tm_eff = _round_up(pl.cdiv(M8, n_steps), 8)

    grid_steps = pl.cdiv(M, tm_eff)   # ragged last block handled by Pallas

    x2 = x.reshape(M, H)              # no jnp.pad -> no extra HBM copy of x

    footprint = _vmem_footprint(tm_eff, H, x_itemsize, w_itemsize)
    vmem_limit = int(min(vmem_budget, max(footprint + (8 << 20), 32 << 20)))

    cost = pl.CostEstimate(
        flops=2 * M * H * H + 8 * M * H,
        transcendentals=M,
        bytes_accessed=2 * M * H * x_itemsize + H * H * w_itemsize + 4 * H,
    )

    kernel = functools.partial(_sublayer_connection_kernel,
                               mxu_dtype=mxu_dtype, precision=precision)

    # Constant-index operands: whole array resident in VMEM, single-buffered.
    const_spec = pl.BlockSpec(memory_space=pltpu.MemorySpace.VMEM)

    out = pl.pallas_call(
        kernel,
        out_shape=jax.ShapeDtypeStruct((M, H), x.dtype),
        grid_spec=pltpu.PrefetchScalarGridSpec(
            num_scalar_prefetch=0,
            grid=(grid_steps,),
            in_specs=[
                pl.BlockSpec((tm_eff, H), lambda i: (i, 0)),   # x tile
                const_spec,                                    # folded W
                const_spec,                                    # folded bias
            ],
            out_specs=pl.BlockSpec((tm_eff, H), lambda i: (i, 0)),
        ),
        compiler_params=pltpu.CompilerParams(
            dimension_semantics=("parallel",),
            vmem_limit_bytes=vmem_limit,
        ),
        cost_estimate=cost,
    )(x2, w_fold, b_fold)

    return out.reshape(B, S, H)


def _reference(x, gamma, beta, w, b):
    x32 = x.astype(jnp.float32)
    u = jnp.mean(x32, axis=-1, keepdims=True)
    xc = x32 - u
    s = jnp.mean(xc * xc, axis=-1, keepdims=True)
    xn = gamma * (xc / jnp.sqrt(s + EPS)) + beta
    y = jnp.einsum("bsh,hk->bsk", xn, w.astype(jnp.float32),
                   precision=lax.Precision.HIGHEST) + b
    return (x32 + y).astype(x.dtype)


if __name__ == "__main__":
    key = jax.random.PRNGKey(0)
    B, S, H = 2, 8, 32  # small correctness shape; production H is a multiple of 128

    kx, kw, kb = jax.random.split(key, 3)
    x = jax.random.normal(kx, (B, S, H), dtype=jnp.float32)

    # Deterministic parameter init (shapes from module __init__):
    gamma = jnp.ones((H,), dtype=jnp.float32)     # LayerNorm weight
    beta = jnp.zeros((H,), dtype=jnp.float32)     # LayerNorm bias
    # Sublayer (Linear H->H), stored [in, out] so the kernel does xn @ W.
    w = jax.random.normal(kw, (H, H), dtype=jnp.float32) * 0.02
    b = jax.random.normal(kb, (H,), dtype=jnp.float32) * 0.02

    out = jax.block_until_ready(sublayer_connection(x, gamma, beta, w, b))
    ref = _reference(x, gamma, beta, w, b)
    assert out.shape == (B, S, H)
    assert jnp.allclose(out, ref, atol=2e-5, rtol=2e-5), "mismatch vs reference"

    # Ragged row count (M = 15, not a multiple of 8): exercises the masked
    # edge block taken without any wrapper-side padding copy.
    x_r = jax.random.normal(kx, (3, 5, H), dtype=jnp.float32)
    out_r = jax.block_until_ready(sublayer_connection(x_r, gamma, beta, w, b))
    ref_r = _reference(x_r, gamma, beta, w, b)
    assert out_r.shape == (3, 5, H)
    assert jnp.allclose(out_r, ref_r, atol=2e-5, rtol=2e-5), "ragged mismatch"

    print("KERNEL_OK")
</pallas_src>

<mosaic_0001>
module attributes {stable_mosaic.version = 11 : i64} {
  func.func @_sublayer_connection_kernel(%arg0: i32, %arg1: memref<16x32xf32, #tpu.memory_space<vmem>>, %arg2: memref<32x32xf32, #tpu.memory_space<vmem>>, %arg3: memref<1x32xf32, #tpu.memory_space<vmem>>, %arg4: memref<16x32xf32, #tpu.memory_space<vmem>>) attributes {dimension_semantics = [#tpu.dimension_semantics<parallel>], iteration_bounds = array<i64: 1>, scalar_prefetch = 0 : i64, scratch_operands = 0 : i64, tpu.core_type = #tpu.core_type<tc>, window_params = [{transform_indices = @transform_0, window_bounds = array<i64: 16, 32>}, {pipeline_mode = #tpu.pipeline_mode<synchronous>, transform_indices = @transform_1, window_bounds = array<i64: 32, 32>}, {pipeline_mode = #tpu.pipeline_mode<synchronous>, transform_indices = @transform_2, window_bounds = array<i64: 1, 32>}, {transform_indices = @transform_3, window_bounds = array<i64: 16, 32>}]} {
    %c0 = arith.constant 0 : index
    %c0_0 = arith.constant 0 : index
    %0 = vector.load %arg1[%c0, %c0_0] : memref<16x32xf32, #tpu.memory_space<vmem>>, vector<16x32xf32>
    %cst = arith.constant dense<0.000000e+00> : vector<16xf32>
    %1 = vector.multi_reduction <add>, %0, %cst [1] : vector<16x32xf32> to vector<16xf32>
    %2 = vector.shape_cast %1 : vector<16xf32> to vector<16x1xf32>
    %cst_1 = arith.constant 3.200000e+01 : f32
    %3 = vector.broadcast %cst_1 : f32 to vector<16x1xf32>
    %4 = arith.divf %2, %3 : vector<16x1xf32>
    %5 = vector.broadcast %4 : vector<16x1xf32> to vector<16x32xf32>
    %6 = arith.subf %0, %5 : vector<16x32xf32>
    %7 = arith.mulf %6, %6 : vector<16x32xf32>
    %cst_2 = arith.constant dense<0.000000e+00> : vector<16xf32>
    %8 = vector.multi_reduction <add>, %7, %cst_2 [1] : vector<16x32xf32> to vector<16xf32>
    %9 = vector.shape_cast %8 : vector<16xf32> to vector<16x1xf32>
    %cst_3 = arith.constant 3.200000e+01 : f32
    %10 = vector.broadcast %cst_3 : f32 to vector<16x1xf32>
    %11 = arith.divf %9, %10 : vector<16x1xf32>
    %cst_4 = arith.constant 9.99999996E-13 : f32
    %12 = vector.broadcast %cst_4 : f32 to vector<16x1xf32>
    %13 = arith.addf %11, %12 : vector<16x1xf32>
    %14 = math.rsqrt %13 : vector<16x1xf32>
    %15 = vector.broadcast %14 : vector<16x1xf32> to vector<16x32xf32>
    %16 = arith.mulf %6, %15 : vector<16x32xf32>
    %c0_5 = arith.constant 0 : index
    %c0_6 = arith.constant 0 : index
    %17 = vector.load %arg2[%c0_5, %c0_6] : memref<32x32xf32, #tpu.memory_space<vmem>>, vector<32x32xf32>
    %cst_7 = arith.constant dense<0.000000e+00> : vector<16x32xf32>
    %18 = tpu.matmul %16, %17, %cst_7 {dimension_numbers = #tpu.dot_dimension_numbers<[1], [0], [0], [1], [0, 0, 1, 1], [], []>, precision = #tpu.contract_precision<fp32>} : vector<16x32xf32>, vector<32x32xf32>, vector<16x32xf32> -> vector<16x32xf32>
    %c0_8 = arith.constant 0 : index
    %c0_9 = arith.constant 0 : index
    %19 = vector.load %arg3[%c0_8, %c0_9] : memref<1x32xf32, #tpu.memory_space<vmem>>, vector<1x32xf32>
    %20 = vector.broadcast %19 : vector<1x32xf32> to vector<16x32xf32>
    %21 = arith.addf %18, %20 : vector<16x32xf32>
    %22 = arith.addf %0, %21 : vector<16x32xf32>
    %c0_10 = arith.constant 0 : index
    %c0_11 = arith.constant 0 : index
    %23 = vector.load %arg4[%c0_10, %c0_11] : memref<16x32xf32, #tpu.memory_space<vmem>>, vector<16x32xf32>
    tpu.vector_store %arg4[%c0_10, %c0_11], %22 {strides = array<i32>} : memref<16x32xf32, #tpu.memory_space<vmem>>, vector<16x32xf32>,
    return
  }
  func.func @transform_0(%arg0: i32) -> (i32, i32) {
    %c0_i32 = arith.constant 0 : i32
    %c0_i32_0 = arith.constant 0 : i32
    return %arg0, %c0_i32 : i32, i32
  }
  func.func @transform_1(%arg0: i32) -> (i32, i32) {
    %c0_i32 = arith.constant 0 : i32
    %c0_i32_0 = arith.constant 0 : i32
    %c0_i32_1 = arith.constant 0 : i32
    return %c0_i32, %c0_i32_0 : i32, i32
  }
  func.func @transform_2(%arg0: i32) -> (i32, i32) {
    %c0_i32 = arith.constant 0 : i32
    %c0_i32_0 = arith.constant 0 : i32
    %c0_i32_1 = arith.constant 0 : i32
    return %c0_i32, %c0_i32_0 : i32, i32
  }
  func.func @transform_3(%arg0: i32) -> (i32, i32) {
    %c0_i32 = arith.constant 0 : i32
    %c0_i32_0 = arith.constant 0 : i32
    return %arg0, %c0_i32 : i32, i32
  }
}

</mosaic_0001>

<bundles_post_ra>
// kernel: tpu_custom_call.1
= control target key start
LH: loop header
LB: loop body
LE: loop exit
PB: predicated region body
PF: predicated region fallthrough
CT: control target
= control target key end

     0   :  { %8 = vsyncpa [#allocation3], 0  ;;  %s991_s0 = inlined_call_operand.hbm [shape: f32[16,32], index: 0, kind: input, shape index: {}]   ;;  %s992_s1 = inlined_call_operand.hbm [shape: f32[32,32], index: 1, kind: input, shape index: {}]   ;;  %s993_s2 = inlined_call_operand.vmem [shape: f32[1,32], index: 2, kind: input, shape index: {}]   ;;  %s994_s3 = inlined_call_operand.hbm [shape: f32[16,32], index: 3, kind: output, shape index: {}]  }
   0x1   :  { %9 = vsyncpa [#allocation6], 0 }
   0x2   :  { %10 = vsyncpa [#allocation4], 0  ;;  %s884_s12 = smov [#allocation2]   ;;  %s812_s16 = scalar_lea.hbm %s991_s0, 256 }
   0x3   :  { %s16_s13 = sshll.u32 %s884_s12, 4  ;;  %p813_p0 = scmp.ne.s32.totalorder %s991_s0, %s812_s16  ;;  %s17_s13 = int_to_ptr.vmem [resolvable:$true] %s16_s13 }
   0x4   :  { %p816_p1 = scmp.lt.u32.totalorder %s812_s16, %s991_s0 }
   0x6   :  { %p818_p2 = pnand %p816_p1, %p813_p0 }
   0x8   :  { %821 = shalt.err (!%p818_p2)
}
   0x9   :  { %s822_s21 = scalar_lea.vmem %s17_s13, 256  ;;  %p827_p4 = scmp.lt.s32.totalorder %s17_s13, %s17_s13 }
   0xa   :  { %p823_p3 = scmp.ne.s32.totalorder %s17_s13, %s822_s21  ;;  %p828_p5 = scmp.lt.s32.totalorder %s822_s21, %s822_s21 }
   0xc   :  { %p829_p6 = por %p828_p5, %p827_p4 }
   0xe   :  { %p830_p7 = pnand %p829_p6, %p823_p3 }
  0x10   :  { %833 = shalt.err (!%p830_p7)
}
  0x11   :  { %s885_s22 = smov 128   ;;  %s886_s23 = smov 8  }
  0x12   :  { %22 = dma.hbm_to_vmem [thread:$0]  %s991_s0, 256, %s17_s13, [#allocation3], %s885_s22, %s885_s22, %s886_s23  }
  0x13   :  { %s887_s26 = smov [#allocation5]   ;;  %s834_s30 = scalar_lea.hbm %s992_s1, 512 }
  0x14   :  { %s28_s27 = sshll.u32 %s887_s26, 4  ;;  %p835_p8 = scmp.ne.s32.totalorder %s992_s1, %s834_s30  ;;  %s29_s27 = int_to_ptr.vmem [resolvable:$true] %s28_s27 }
  0x15   :  { %p838_p9 = scmp.lt.u32.totalorder %s834_s30, %s992_s1 }
  0x17   :  { %p840_p10 = pnand %p838_p9, %p835_p8 }
  0x19   :  { %843 = shalt.err (!%p840_p10)
}
  0x1a   :  { %s844_s8 = scalar_lea.vmem %s29_s27, 512  ;;  %p849_p12 = scmp.lt.s32.totalorder %s29_s27, %s29_s27 }
  0x1b   :  { %p845_p11 = scmp.ne.s32.totalorder %s29_s27, %s844_s8  ;;  %p850_p13 = scmp.lt.s32.totalorder %s844_s8, %s844_s8 }
  0x1d   :  { %p851_p0 = por %p850_p13, %p849_p12 }
  0x1f   :  { %p852_p1 = pnand %p851_p0, %p845_p11 }
  0x21   :  { %855 = shalt.err (!%p852_p1)
}
  0x22   :  { %34 = dma.hbm_to_vmem [thread:$0]  %s992_s1, 512, %s29_s27, [#allocation6], %s885_s22, %s885_s22, %s886_s23  }
  0x23   :  { %878 = dma.done.wait [#allocation3], 256  }
  0x24   :  { %879 = vsyncadd [#allocation3], 4294967040 }
  0x25   :  { %880 = dma.done.wait [#allocation6], 512  }
  0x26   :  { %881 = vsyncadd [#allocation6], 4294966784  ;;  %vm45_vm0 = vcmask 261120   ;;  %v939_v0 = vld [vmem:[#allocation2] sm:$0xff]  ;;  %v941_v1 = vld [vmem:[#allocation2 + $0x8] sm:$0xff]  ;;  %s888_s11 = smov [#allocation7]  }
  0x27   :  { %v46_v2 = vsel %vm45_vm0, %v939_v0, 0.0  ;;  %v49_v3 = vsel %vm45_vm0, %v941_v1, 0.0  ;;  %v73_v14 = vld [vmem:[#allocation5] sm:$0xff]  ;;  %v74_v15 = vld [vmem:[#allocation5 + $0x8] sm:$0xff]  ;;  %v75_v16 = vld [vmem:[#allocation5 + $0x10] sm:$0xff]  ;;  %s627_s12 = sshll.u32 %s888_s11, 4  ;;  %s628_s12 = int_to_ptr.vmem [resolvable:$true] %s627_s12 }
  0x28   :  { %47 = vadd.xlane.f32.xlu0 %v46_v2  ;;  %v91_v17 = vand.u32 4294901760, %v73_v14  ;;  %v94_v18 = vand.u32 4294901760, %v74_v15  ;;  %v76_v19 = vld [vmem:[#allocation5 + $0x18] sm:$0xff]  ;;  %v97_v20 = vand.u32 4294901760, %v75_v16  ;;  %s856_s13 = scalar_lea.vmem %s628_s12, 256  ;;  %p861_p3 = scmp.lt.s32.totalorder %s628_s12, %s628_s12 }
  0x29   :  { %v100_v21 = vand.u32 4294901760, %v76_v19  ;;  %p857_p2 = scmp.ne.s32.totalorder %s628_s12, %s856_s13  ;;  %p862_p4 = scmp.lt.s32.totalorder %s856_s13, %s856_s13 }
  0x2a   :  { %v951_v22 = vpack.c.bf16 %v94_v18, %v91_v17  ;;  %v181_v24 = vsub.f32 %v73_v14, %v91_v17  ;;  %v188_v25 = vsub.f32 %v74_v15, %v94_v18  ;;  %v195_v31 = vsub.f32 %v75_v16, %v97_v20 }
  0x2b   :  { %v953_v23 = vpack.c.bf16 %v100_v21, %v97_v20  ;;  %v202_v32 = vsub.f32 %v76_v19, %v100_v21  ;;  %p863_p5 = por %p862_p4, %p861_p3 }
  0x2c   :  { %50 = vadd.xlane.f32.xlu0 %v49_v3  ;;  %768 = vmatprep.subr.bf16.mxu0 %v951_v22  ;;  %v182_v26 = vand.u32 4294901760, %v181_v24  ;;  %v189_v27 = vand.u32 4294901760, %v188_v25  ;;  %v196_v35 = vand.u32 4294901760, %v195_v31  ;;  %v759_v44 = vpack.c.bf16 %v188_v25, %v181_v24 }
  0x2d   :  { %744 = vmatprep.subr.bf16.mxu1 %v951_v22  ;;  %770 = vmatpush3.bf16.msra.mxu0 %v951_v22  ;;  %v203_v36 = vand.u32 4294901760, %v202_v32  ;;  %v763_v45 = vpack.c.bf16 %v202_v32, %v195_v31  ;;  %p864_p6 = pnand %p863_p5, %p857_p2 }
  0x2e   :  { %746 = vmatpush3.bf16.msra.mxu1 %v951_v22  ;;  %772 = vmatprep.subr.bf16.mxu0 %v953_v23  ;;  %v775_v28 = vpack.c.bf16 %v189_v27, %v182_v26  ;;  %v183_v29 = vsub.f32 %v181_v24, %v182_v26  ;;  %v190_v30 = vsub.f32 %v188_v25, %v189_v27 }
  0x2f   :  { %748 = vmatprep.subr.bf16.mxu1 %v953_v23  ;;  %v779_v38 = vpack.c.bf16 %v203_v36, %v196_v35  ;;  %v197_v39 = vsub.f32 %v195_v31, %v196_v35  ;;  %v204_v40 = vsub.f32 %v202_v32, %v203_v36 }
  0x30   :  { %v184_v33 = vand.u32 4294901760, %v183_v29  ;;  %v191_v34 = vand.u32 4294901760, %v190_v30 }
  0x31   :  { %774 = vmatpush3.bf16.msra.mxu0 %v953_v23  ;;  %v198_v41 = vand.u32 4294901760, %v197_v39  ;;  %v205_v42 = vand.u32 4294901760, %v204_v40 }
  0x32   :  { %750 = vmatpush3.bf16.msra.mxu1 %v953_v23  ;;  %776 = vmatprep.subr.bf16.mxu0 %v775_v28  ;;  %v751_v37 = vpack.c.bf16 %v191_v34, %v184_v33 }
  0x33   :  { %v755_v43 = vpack.c.bf16 %v205_v42, %v198_v41 }
  0x34   :  { %752 = vmatprep.subr.bf16.mxu1 %v751_v37 }
  0xb5   :  { %v48_v4 = vpop.xlane.xlu0 %47 }
  0xb6   :  { %v53_v5 = vmul.f32 0.03125, %v48_v4 }
  0xb8   :  { %v55_v6 = vsub.f32 %v939_v0, %v53_v5 }
  0xb9   :  { %v51_v7 = vpop.xlane.xlu0 %50 }
  0xba   :  { %v54_v8 = vmul.f32 0.03125, %v51_v7  ;;  %v57_v9 = vmul.f32 %v55_v6, %v55_v6 }
  0xbc   :  { %v56_v10 = vsub.f32 %v941_v1, %v54_v8  ;;  %v59_v11 = vsel %vm45_vm0, %v57_v9, 0.0  ;;  %v640_v8 = vld [vmem:[%s993_s2] ss:$0 sm:$0xff] }
  0xbd   :  { %60 = vadd.xlane.f32.xlu1 %v59_v11 }
  0xbe   :  { %v58_v12 = vmul.f32 %v56_v10, %v56_v10 }
  0xc0   :  { %v62_v13 = vsel %vm45_vm0, %v58_v12, 0.0 }
  0xc1   :  { %63 = vadd.xlane.f32.xlu1 %v62_v13 }
 0x14a   :  { %v61_v46 = vpop.xlane.xlu1 %60 }
 0x14b   :  { %v65_v47 = vmul.f32 0.03125, %v61_v46 }
 0x14d   :  { %v67_v48 = vadd.f32 1e-12, %v65_v47 }
 0x14e   :  { %v64_v49 = vpop.xlane.xlu1 %63 }
 0x14f   :  { %808 = vrsqrt.f32 %v67_v48  ;;  %v66_v50 = vmul.f32 0.03125, %v64_v49 }
 0x151   :  { %v68_v51 = vadd.f32 1e-12, %v66_v50 }
 0x153   :  { %810 = vrsqrt.f32 %v68_v51 }
 0x159   :  { %v809_v52 = vpop.eup %808 }
 0x15a   :  { %v71_v53 = vmul.f32 %v809_v52, %v55_v6 }
 0x15c   :  { %v85_v54 = vsel %vm45_vm0, %v71_v53, 0 }
 0x15d   :  { %v811_v55 = vpop.eup %810  ;;  %v159_v56 = vand.u32 4294901760, %v85_v54 }
 0x15e   :  { %v72_v57 = vmul.f32 %v811_v55, %v56_v10 }
 0x15f   :  { %v160_v58 = vsub.f32 %v85_v54, %v159_v56 }
 0x160   :  { %v88_v59 = vsel %vm45_vm0, %v72_v57, 0 }
 0x161   :  { %v161_v60 = vand.u32 4294901760, %v160_v58  ;;  %v169_v61 = vand.u32 4294901760, %v88_v59 }
 0x163   :  { %718 = vmatprep.mubr.f32.mxu0 %v161_v60  ;;  %v162_v62 = vsub.f32 %v160_v58, %v161_v60  ;;  %v170_v63 = vsub.f32 %v88_v59, %v169_v61 }
 0x165   :  { %v163_v2 = vand.u32 4294901760, %v162_v62  ;;  %v171_v3 = vand.u32 4294901760, %v170_v63 }
 0x167   :  { %685 = vmatprep.mubr.f32.mxu1 %v163_v2  ;;  %719 = vmatmul.mubr.f32.vlgmr.msra.gmra.mrb[0].mxu0 %v171_v3  ;;  %v172_v4 = vsub.f32 %v170_v63, %v171_v3 }
 0x168   :  { %778 = vmatpush3.bf16.msra.mxu0 %v775_v28  ;;  %729 = vmatprep.mubr.f32.mxu0 %v159_v56 }
 0x169   :  { %v173_v5 = vand.u32 4294901760, %v172_v4  ;;  %780 = vmatprep.subr.bf16.mxu0 %v779_v38 }
 0x16b   :  { %686 = vmatmul.mubr.f32.vlgmr.msra.gmra.mrb[0].mxu1 %v173_v5 }
 0x16c   :  { %754 = vmatpush3.bf16.msra.mxu1 %v751_v37  ;;  %696 = vmatprep.mubr.f32.mxu1 %v159_v56 }
 0x16d   :  { %782 = vmatpush3.bf16.msra.mxu0 %v779_v38  ;;  %756 = vmatprep.subr.bf16.mxu1 %v755_v43 }
 0x16e   :  { %784 = vmatprep.subr.bf16.mxu0 %v951_v22 }
 0x170   :  { %758 = vmatpush3.bf16.msra.mxu1 %v755_v43  ;;  %730 = vmatmul.mubr.f32.vlgmr.msra.gmra.mrb[0].mxu0 %v169_v61 }
 0x171   :  { %786 = vmatpush3.bf16.msra.mxu0 %v951_v22  ;;  %740 = vmatprep.mubr.f32.mxu0 %v159_v56 }
 0x172   :  { %760 = vmatprep.subr.bf16.mxu1 %v759_v44  ;;  %788 = vmatprep.subr.bf16.mxu0 %v953_v23 }
 0x173   :  { %697 = vmatmul.mubr.f32.vlgmr.msra.gmra.mrb[0].mxu1 %v169_v61 }
 0x174   :  { %762 = vmatpush3.bf16.msra.mxu1 %v759_v44  ;;  %707 = vmatprep.mubr.f32.mxu1 %v160_v58 }
 0x175   :  { %790 = vmatpush3.bf16.msra.mxu0 %v953_v23  ;;  %764 = vmatprep.subr.bf16.mxu1 %v763_v45 }
 0x178   :  { %766 = vmatpush3.bf16.msra.mxu1 %v763_v45  ;;  %741 = vmatmul.mubr.f32.vlgmr.msra.gmra.mrb[0].mxu0 %v169_v61 }
 0x17b   :  { %708 = vmatmul.mubr.f32.vlgmr.msra.gmra.mrb[0].mxu1 %v170_v63 }
 0x24b   :  { %v742_v6 = vpop.f32.mrb[0].mxu0 }
 0x24c   :  { %v608_v7 = vpop.f32.mrb[1].mxu0 }
 0x24e   :  { %v709_v9 = vpop.f32.mrb[0].mxu1 }
 0x24f   :  { %v791_v10 = vadd.f32 %v709_v9, %v640_v8  ;;  %v352_v11 = vpop.f32.mrb[1].mxu1 }
 0x250   :  { %v793_v12 = vadd.f32 %v640_v8, %v352_v11 }
 0x251   :  { %v792_v13 = vadd.f32 %v791_v10, %v742_v6 }
 0x252   :  { %v794_v14 = vadd.f32 %v793_v12, %v608_v7 }
 0x253   :  { %v619_v15 = vadd.f32 %v792_v13, %v941_v1 }
 0x254   :  { %v618_v16 = vadd.f32 %v794_v14, %v939_v0 }
 0x255   :  { %621 = vst.msk [vmem:[#allocation7 + $0x8] sm:$0xff] %vm45_vm0, %v619_v15 }
 0x256   :  { %620 = vst.msk [vmem:[#allocation7] sm:$0xff] %vm45_vm0, %v618_v16 }
 0x257   :  { %867 = shalt.err (!%p864_p6)
}
 0x258   :  { %s868_s15 = scalar_lea.hbm %s994_s3, 256 }
 0x259   :  { %p869_p7 = scmp.ne.s32.totalorder %s994_s3, %s868_s15  ;;  %p872_p8 = scmp.lt.u32.totalorder %s868_s15, %s994_s3 }
 0x25b   :  { %p874_p9 = pnand %p872_p8, %p869_p7 }
 0x25d   :  { %877 = shalt.err (!%p874_p9)
}
 0x25e   :  { %633 = dma.vmem_to_hbm [thread:$0]  %s628_s12, 256, %s994_s3, [#allocation4], %s885_s22, %s885_s22, %s886_s23  }
 0x25f   :  { %882 = dma.done.wait [#allocation4], 256  }
 0x260   :  { %883 = vsyncadd [#allocation4], 4294967040 }
 0x261   :  { %637 = vsyncpa [#allocation3], 1 }
 0x262   :  { %638 = vsyncpa [#allocation6], 1 }
 0x263   :  { %639 = vsyncpa [#allocation4], 1 }

</bundles_post_ra>
